<compile_context>
chip_gen: v6e
topology: v6e:2x2x1
jax: 0.10.0
libtpu: 0.0.40
codegen_flags: <defaults>
</compile_context>

<pallas_src>
import functools

import jax
import jax.numpy as jnp
from jax.experimental import pallas as pl
from jax.experimental.pallas import tpu as pltpu

_LANES = 128


def _round_up(x: int, m: int) -> int:
    return ((x + m - 1) // m) * m


def _ips_loss_kernel(hx_ref, h0_ref, d_ref, out_ref, sum_acc, sq_acc, *,
                     M, lambda_val, inv_n, inv_nm1, approx_recip):
    step = pl.program_id(0)

    @pl.when(step == 0)
    def _init():
        sum_acc[...] = jnp.zeros_like(sum_acc)
        sq_acc[...] = jnp.zeros_like(sq_acc)

    # Elementwise hot path (VPU only): ratio, lower clip, weight by deltas.
    # Accumulate per-lane partial sums; no cross-lane (XLU) work per step.
    hx = hx_ref[...].astype(jnp.float32)
    h0 = h0_ref[...].astype(jnp.float32)
    d = d_ref[...].astype(jnp.float32)

    if approx_recip:
        ratio = hx * pl.reciprocal(h0, approx=True)   # EUP slot; ~2^-12 rel err
    else:
        ratio = hx / h0                               # exact
    u = jnp.maximum(ratio, M) * d                     # nn.Threshold(M, M)

    sum_acc[...] += u
    sq_acc[...] += u * u

    @pl.when(step == pl.num_programs(0) - 1)
    def _finalize():
        s = jnp.sum(sum_acc[...])
        ss = jnp.sum(sq_acc[...])
        mean_u = s * inv_n
        # Unbiased variance, single pass: (sum(u^2) - sum(u)^2/n) / (n-1).
        var_u = (ss - s * s * inv_n) * inv_nm1
        var_u = jnp.maximum(var_u, 0.0)               # guard fp cancellation
        loss = mean_u + lambda_val * jnp.sqrt(var_u * inv_n)
        out_ref[...] = jnp.reshape(loss, (1, 1))


def ips_loss_pallas(hx, h0, deltas, *, M, lambda_val, block_rows=512,
                    approx_recip=False):
    """Streaming Pallas IPS loss. hx, h0, deltas: (N,) arrays. Returns f32 scalar."""
    n = deltas.shape[0]
    if n < 2:
        raise ValueError("IpsLoss needs at least 2 samples (unbiased variance).")

    rows = pl.cdiv(n, _LANES)
    block_rows = max(8, min(_round_up(block_rows, 8), _round_up(rows, 8)))
    rows_pad = _round_up(rows, block_rows)
    n_pad = rows_pad * _LANES
    pad = n_pad - n

    # Pad so the tail contributes exactly 0: u_pad = max(0/1, M) * 0 = 0.
    hx_p = jnp.pad(hx, (0, pad)).reshape(rows_pad, _LANES)
    h0_p = jnp.pad(h0, (0, pad), constant_values=1).reshape(rows_pad, _LANES)
    d_p = jnp.pad(deltas, (0, pad)).reshape(rows_pad, _LANES)

    kernel = functools.partial(
        _ips_loss_kernel,
        M=float(M),
        lambda_val=float(lambda_val),
        inv_n=1.0 / n,
        inv_nm1=1.0 / (n - 1),
        approx_recip=approx_recip,
    )

    spec = pl.BlockSpec((block_rows, _LANES), lambda i: (i, 0))
    # TODO(synk): v7x 2-TC split — add a leading "parallel" core axis emitting
    # per-core (sum, sumsq) partials, combined in a tiny JAX epilogue.
    out = pl.pallas_call(
        kernel,
        out_shape=jax.ShapeDtypeStruct((1, 1), jnp.float32),
        grid=(rows_pad // block_rows,),
        in_specs=[spec, spec, spec],
        out_specs=pl.BlockSpec((1, 1), lambda i: (0, 0)),
        scratch_shapes=[
            pltpu.VMEM((block_rows, _LANES), jnp.float32),
            pltpu.VMEM((block_rows, _LANES), jnp.float32),
        ],
        compiler_params=pltpu.CompilerParams(
            dimension_semantics=("arbitrary",),
        ),
    )(hx_p, h0_p, d_p)
    return out[0, 0]


def _ips_loss_jnp(hx, h0, deltas, *, M, lambda_val):
    n = deltas.shape[0]
    u = jnp.maximum(hx.astype(jnp.float32) / h0.astype(jnp.float32), float(M))
    u = u * deltas.astype(jnp.float32)
    return jnp.mean(u) + float(lambda_val) * jnp.sqrt(jnp.var(u, ddof=1) / n)


def ips_loss(hx, h0, deltas, *, M, lambda_val, block_rows=512,
             approx_recip=False, force_pallas=False, min_pallas_n=65536):
    """IPS loss. Small batches use plain jnp (kernel launch overhead dominates)."""
    n = deltas.shape[0]
    if n < min_pallas_n and not force_pallas:
        return _ips_loss_jnp(hx, h0, deltas, M=M, lambda_val=lambda_val)
    return ips_loss_pallas(hx, h0, deltas, M=M, lambda_val=lambda_val,
                           block_rows=block_rows, approx_recip=approx_recip)


if __name__ == "__main__":
    # Deterministic "config" (no checkpoint / file loads).
    M = 1.0           # clipping threshold
    lambda_val = 0.5  # variance-penalty weight
    N = 20000         # enough samples to exercise a multi-step grid + padding

    key = jax.random.PRNGKey(0)
    k1, k2, k3 = jax.random.split(key, 3)
    hx = jax.random.uniform(k1, (N,), jnp.float32, minval=0.05, maxval=1.0)
    h0 = jax.random.uniform(k2, (N,), jnp.float32, minval=0.05, maxval=1.0)
    deltas = jax.random.uniform(k3, (N,), jnp.float32, minval=0.0, maxval=1.0)

    # block_rows=64 -> (64,128)=8192-sample tiles -> 3 pipelined grid steps.
    out = jax.block_until_ready(
        ips_loss(hx, h0, deltas, M=M, lambda_val=lambda_val,
                 block_rows=64, force_pallas=True)
    )

    # Pure-JAX reference (mirrors the PyTorch forward exactly).
    u_ref = jnp.maximum(hx / h0, M) * deltas
    ref = jnp.mean(u_ref) + lambda_val * jnp.sqrt(jnp.var(u_ref, ddof=1) / N)

    assert jnp.allclose(out, ref, rtol=1e-4, atol=1e-6), (out, ref)
    print("KERNEL_OK")
</pallas_src>

<mosaic_0001>
module attributes {stable_mosaic.version = 11 : i64} {
  func.func @_ips_loss_kernel(%arg0: i32, %arg1: memref<64x128xf32, #tpu.memory_space<vmem>>, %arg2: memref<64x128xf32, #tpu.memory_space<vmem>>, %arg3: memref<64x128xf32, #tpu.memory_space<vmem>>, %arg4: memref<1x1xf32, #tpu.memory_space<vmem>>, %arg5: memref<64x128xf32, #tpu.memory_space<vmem>>, %arg6: memref<64x128xf32, #tpu.memory_space<vmem>>) attributes {dimension_semantics = [#tpu.dimension_semantics<arbitrary>], iteration_bounds = array<i64: 3>, scalar_prefetch = 0 : i64, scratch_operands = 2 : i64, tpu.core_type = #tpu.core_type<tc>, window_params = [{transform_indices = @transform_0, window_bounds = array<i64: 64, 128>}, {transform_indices = @transform_1, window_bounds = array<i64: 64, 128>}, {transform_indices = @transform_2, window_bounds = array<i64: 64, 128>}, {pipeline_mode = #tpu.pipeline_mode<synchronous>, transform_indices = @transform_3, window_bounds = array<i64: 1, 1>}]} {
    %c0_i32 = arith.constant 0 : i32
    %0 = arith.cmpi eq, %arg0, %c0_i32 : i32
    %1 = arith.extui %0 : i1 to i32
    %c0_i32_0 = arith.constant 0 : i32
    %2 = arith.cmpi ne, %1, %c0_i32_0 : i32
    scf.if %2 {
      %cst_15 = arith.constant 0.000000e+00 : f32
      %20 = vector.broadcast %cst_15 : f32 to vector<64x128xf32>
      %c0_16 = arith.constant 0 : index
      %c0_17 = arith.constant 0 : index
      %21 = vector.load %arg5[%c0_16, %c0_17] : memref<64x128xf32, #tpu.memory_space<vmem>>, vector<64x128xf32>
      tpu.vector_store %arg5[%c0_16, %c0_17], %20 {strides = array<i32>} : memref<64x128xf32, #tpu.memory_space<vmem>>, vector<64x128xf32>,
      %cst_18 = arith.constant 0.000000e+00 : f32
      %22 = vector.broadcast %cst_18 : f32 to vector<64x128xf32>
      %c0_19 = arith.constant 0 : index
      %c0_20 = arith.constant 0 : index
      %23 = vector.load %arg6[%c0_19, %c0_20] : memref<64x128xf32, #tpu.memory_space<vmem>>, vector<64x128xf32>
      tpu.vector_store %arg6[%c0_19, %c0_20], %22 {strides = array<i32>} : memref<64x128xf32, #tpu.memory_space<vmem>>, vector<64x128xf32>,
    } else {
    }
    %c0 = arith.constant 0 : index
    %c0_1 = arith.constant 0 : index
    %3 = vector.load %arg1[%c0, %c0_1] : memref<64x128xf32, #tpu.memory_space<vmem>>, vector<64x128xf32>
    %c0_2 = arith.constant 0 : index
    %c0_3 = arith.constant 0 : index
    %4 = vector.load %arg2[%c0_2, %c0_3] : memref<64x128xf32, #tpu.memory_space<vmem>>, vector<64x128xf32>
    %c0_4 = arith.constant 0 : index
    %c0_5 = arith.constant 0 : index
    %5 = vector.load %arg3[%c0_4, %c0_5] : memref<64x128xf32, #tpu.memory_space<vmem>>, vector<64x128xf32>
    %6 = arith.divf %3, %4 : vector<64x128xf32>
    %cst = arith.constant 1.000000e+00 : f32
    %7 = vector.broadcast %cst : f32 to vector<64x128xf32>
    %8 = arith.maximumf %6, %7 : vector<64x128xf32>
    %9 = arith.mulf %8, %5 : vector<64x128xf32>
    %c0_6 = arith.constant 0 : index
    %c0_7 = arith.constant 0 : index
    %10 = vector.load %arg5[%c0_6, %c0_7] : memref<64x128xf32, #tpu.memory_space<vmem>>, vector<64x128xf32>
    %11 = arith.addf %10, %9 : vector<64x128xf32>
    %c0_8 = arith.constant 0 : index
    %c0_9 = arith.constant 0 : index
    %12 = vector.load %arg5[%c0_8, %c0_9] : memref<64x128xf32, #tpu.memory_space<vmem>>, vector<64x128xf32>
    tpu.vector_store %arg5[%c0_8, %c0_9], %11 {strides = array<i32>} : memref<64x128xf32, #tpu.memory_space<vmem>>, vector<64x128xf32>,
    %c0_10 = arith.constant 0 : index
    %c0_11 = arith.constant 0 : index
    %13 = vector.load %arg6[%c0_10, %c0_11] : memref<64x128xf32, #tpu.memory_space<vmem>>, vector<64x128xf32>
    %14 = arith.mulf %9, %9 : vector<64x128xf32>
    %15 = arith.addf %13, %14 : vector<64x128xf32>
    %c0_12 = arith.constant 0 : index
    %c0_13 = arith.constant 0 : index
    %16 = vector.load %arg6[%c0_12, %c0_13] : memref<64x128xf32, #tpu.memory_space<vmem>>, vector<64x128xf32>
    tpu.vector_store %arg6[%c0_12, %c0_13], %15 {strides = array<i32>} : memref<64x128xf32, #tpu.memory_space<vmem>>, vector<64x128xf32>,
    %c2_i32 = arith.constant 2 : i32
    %17 = arith.cmpi eq, %arg0, %c2_i32 : i32
    %18 = arith.extui %17 : i1 to i32
    %c0_i32_14 = arith.constant 0 : i32
    %19 = arith.cmpi ne, %18, %c0_i32_14 : i32
    scf.if %19 {
      %c0_15 = arith.constant 0 : index
      %c0_16 = arith.constant 0 : index
      %20 = vector.load %arg5[%c0_15, %c0_16] : memref<64x128xf32, #tpu.memory_space<vmem>>, vector<64x128xf32>
      %21 = vector.shape_cast %20 : vector<64x128xf32> to vector<1x64x128xf32>
      %cst_17 = arith.constant dense<0.000000e+00> : vector<1xf32>
      %22 = vector.multi_reduction <add>, %21, %cst_17 [1, 2] : vector<1x64x128xf32> to vector<1xf32>
      %23 = vector.shape_cast %22 : vector<1xf32> to vector<1x1x1xf32>
      %24 = vector.extract %23[0, 0, 0] : f32 from vector<1x1x1xf32>
      %c0_18 = arith.constant 0 : index
      %c0_19 = arith.constant 0 : index
      %25 = vector.load %arg6[%c0_18, %c0_19] : memref<64x128xf32, #tpu.memory_space<vmem>>, vector<64x128xf32>
      %26 = vector.shape_cast %25 : vector<64x128xf32> to vector<1x64x128xf32>
      %cst_20 = arith.constant dense<0.000000e+00> : vector<1xf32>
      %27 = vector.multi_reduction <add>, %26, %cst_20 [1, 2] : vector<1x64x128xf32> to vector<1xf32>
      %28 = vector.shape_cast %27 : vector<1xf32> to vector<1x1x1xf32>
      %29 = vector.extract %28[0, 0, 0] : f32 from vector<1x1x1xf32>
      %cst_21 = arith.constant 5.000000e-05 : f32
      %30 = arith.mulf %24, %cst_21 : f32
      %31 = arith.mulf %24, %24 : f32
      %cst_22 = arith.constant 5.000000e-05 : f32
      %32 = arith.mulf %31, %cst_22 : f32
      %33 = arith.subf %29, %32 : f32
      %cst_23 = arith.constant 5.000250e-05 : f32
      %34 = arith.mulf %33, %cst_23 : f32
      %cst_24 = arith.constant 0.000000e+00 : f32
      %35 = arith.maximumf %34, %cst_24 : f32
      %cst_25 = arith.constant 5.000000e-05 : f32
      %36 = arith.mulf %35, %cst_25 : f32
      %37 = math.sqrt %36 : f32
      %cst_26 = arith.constant 5.000000e-01 : f32
      %38 = arith.mulf %cst_26, %37 : f32
      %39 = arith.addf %30, %38 : f32
      %40 = vector.broadcast %39 : f32 to vector<1x1xf32>
      %c0_27 = arith.constant 0 : index
      %c0_28 = arith.constant 0 : index
      %41 = vector.load %arg4[%c0_27, %c0_28] : memref<1x1xf32, #tpu.memory_space<vmem>>, vector<1x1xf32>
      tpu.vector_store %arg4[%c0_27, %c0_28], %40 {strides = array<i32>} : memref<1x1xf32, #tpu.memory_space<vmem>>, vector<1x1xf32>,
    } else {
    }
    return
  }
  func.func @transform_0(%arg0: i32) -> (i32, i32) {
    %c0_i32 = arith.constant 0 : i32
    %c0_i32_0 = arith.constant 0 : i32
    return %arg0, %c0_i32 : i32, i32
  }
  func.func @transform_1(%arg0: i32) -> (i32, i32) {
    %c0_i32 = arith.constant 0 : i32
    %c0_i32_0 = arith.constant 0 : i32
    return %arg0, %c0_i32 : i32, i32
  }
  func.func @transform_2(%arg0: i32) -> (i32, i32) {
    %c0_i32 = arith.constant 0 : i32
    %c0_i32_0 = arith.constant 0 : i32
    return %arg0, %c0_i32 : i32, i32
  }
  func.func @transform_3(%arg0: i32) -> (i32, i32) {
    %c0_i32 = arith.constant 0 : i32
    %c0_i32_0 = arith.constant 0 : i32
    %c0_i32_1 = arith.constant 0 : i32
    return %c0_i32, %c0_i32_0 : i32, i32
  }
}

</mosaic_0001>

<bundles_post_ra>
// kernel: tpu_custom_call.1
= control target key start
LH: loop header
LB: loop body
LE: loop exit
PB: predicated region body
PF: predicated region fallthrough
CT: control target
= control target key end

     0   :  { %8 = vsyncpa [#allocation5], 0  ;;  %s1085_s0 = inlined_call_operand.hbm [shape: f32[192,128], index: 0, kind: input, shape index: {}]   ;;  %s1086_s1 = inlined_call_operand.hbm [shape: f32[192,128], index: 1, kind: input, shape index: {}]   ;;  %s1087_s2 = inlined_call_operand.hbm [shape: f32[192,128], index: 2, kind: input, shape index: {}]   ;;  %s1088_s3 = inlined_call_operand.hbm [shape: f32[1,1], index: 3, kind: output, shape index: {}]  }
   0x1   :  { %10 = vsyncpa [#allocation5 + $0x1], 0 }
   0x2   :  { %11 = vsyncpa [#allocation8], 0 }
   0x3   :  { %13 = vsyncpa [#allocation8 + $0x1], 0 }
   0x4   :  { %14 = vsyncpa [#allocation6], 0  ;;  %s851_s12 = smov 0   ;;  %s853_s13 = smov 0  }
   0x5   :  { %s855_s14 = smov 0   ;;  %s857_s15 = smov 0  }
   0x6 LB: > { %s870_s16 = sadd.s32 4294967295, %s821_s15   ;;  %s873_s17 = sadd.s32 1, %s821_s15   ;;  %s821_s15 = sphi %s857_s15, %s1101_s15   ;;  %s817_s14 = sphi %s855_s14, %s1100_s14   ;;  %s813_s13 = sphi %s853_s13, %s1099_s13   ;;  %s809_s12 = sphi %s851_s12, %s1098_s12  }
   0x7   : > { %s24_s18 = ssub.s32 %s821_s15, %s873_s17  ;;  %s27_s19 = sadd.s32 1, %s817_s14 }
   0x8   : > { %p25_p0 = scmp.eq.s32.totalorder %s24_s18, 0  ;;  %p34_p1 = scmp.ne.s32.totalorder %s817_s14, %s813_s13 }
   0x9   : > { %p35_p2 = scmp.eq.s32.totalorder %s821_s15, 0  ;;  %p40_p3 = scmp.ne.s32.totalorder %s813_s13, %s809_s12 }
   0xa   : > { %s883_s20 = scalar_select %p25_p0, %s817_s14, %s27_s19  }
   0xb   : > { %p36_p4 = por %p35_p2, %p34_p1  ;;  %p41_p5 = scmp.eq.s32.totalorder %s870_s16, 0 }
   0xc   : > { %p613_p6 = scmp.lt.s32.totalorder %s821_s15, 3  ;;  %s137_s22 = sand.u32 1, %s817_s14  }
   0xd   : > { %p887_p7 = por %p41_p5, %p40_p3  ;;  %s894_s23 = sshll.u32 %s137_s22, 6 }
   0xe   : > { %s897_s24 = sshll.u32 %s821_s15, 10  ;;  %p899_p8 = pnand %p613_p6, %p36_p4 }
   0xf   : > { %s1090_s21 = scalar_select %p887_p7, 1, 0 }
  0x10   : > { %s158_s26 = sand.u32 1, %s821_s15   ;;  %s908_s29 = scalar_lea.hbm %s1086_s1, %s897_s24 }
  0x11   : > { %s162_s30 = scalar_lea.vmem [#allocation7], %s894_s23  ;;  %s915_s5 = scalar_lea.sflag [#allocation8], %s158_s26 }
  0x12   : > { %s169_s4 = sshll.u32 %s162_s30, 4  ;;  %s671_s6 = scalar_lea.hbm %s908_s29, 1024  ;;  %s912_s4 = int_to_ptr.vmem [resolvable:$true] %s169_s4 }
  0x13   : > { %p672_p11 = scmp.ne.s32.totalorder %s908_s29, %s671_s6  ;;  %p921_p12 = pneg %p899_p8 }
  0x14   : > { %s676_s10 = scalar_lea.hbm %s1086_s1, 3072  ;;  %p677_p1 = scmp.lt.s32.totalorder %s908_s29, %s1086_s1 }
  0x15   : > { %p674_p13 = pnand %p921_p12, %p672_p11  ;;  %p678_p2 = scmp.lt.s32.totalorder %s676_s10, %s671_s6 }
  0x17   : > { %p675_p0 = pneg %p674_p13  ;;  %p679_p3 = por %p678_p2, %p677_p1 }
  0x19   : > { %p680_p4 = pnand %p679_p3, %p675_p0 }
  0x1b   : > { %683 = shalt.err (!%p680_p4)
}
  0x1c   : > { %s684_s18 = scalar_lea.vmem %s912_s4, 1024  ;;  %s823_s19 = smov [#allocation7]  }
  0x1d   : > { %p685_p5 = scmp.ne.s32.totalorder %s912_s4, %s684_s18  ;;  %s689_s26 = sshll.u32 %s823_s19, 4  ;;  %s690_s26 = int_to_ptr.vmem [resolvable:$false] %s689_s26 }
  0x1e   : > { %s691_s27 = scalar_lea.vmem %s690_s26, 2048  ;;  %p692_p13 = scmp.lt.s32.totalorder %s912_s4, %s690_s26 }
  0x1f   : > { %p687_p6 = pnand %p685_p5, %p921_p12  ;;  %p693_p9 = scmp.lt.s32.totalorder %s691_s27, %s684_s18 }
  0x21   : > { %p688_p11 = pneg %p687_p6  ;;  %p694_p10 = por %p693_p9, %p692_p13 }
  0x23   : > { %p695_p7 = pnand %p694_p10, %p688_p11 }
  0x25   : > { %698 = shalt.err (!%p695_p7)
}
  0x26   : > { %s824_s28 = smov 128   ;;  %s825_s30 = smov 8  }
  0x27   : > { %609 = dma.hbm_to_vmem [thread:$0]  (!%p899_p8), %s908_s29, 1024, %s912_s4, %s915_s5, %s824_s28, %s824_s28, %s825_s30  }
  0x28   : > { %p1093_p9 = scmp.lt.s32.totalorder %s821_s15, 4  ;;  %p1094_p7 = scmp.ge.s32.totalorder %s821_s15, 1 }
  0x29   : > { %s959_s10 = scalar_lea.hbm %s1085_s0, %s897_s24  ;;  %s141_s11 = scalar_lea.vmem [#allocation4], %s894_s23 }
  0x2a   : > { %p951_p10 = pnand %p1094_p7, %p1093_p9  ;;  %s148_s12 = sshll.u32 %s141_s11, 4  ;;  %s962_s12 = int_to_ptr.vmem [resolvable:$true] %s148_s12 }
  0x2b   : > { %s968_s15 = scalar_lea.hbm %s1087_s2, %s897_s24  ;;  %s138_s4 = scalar_lea.sflag [#allocation5], %s137_s22 }
  0x2c   : > { %s1095_s6 = scalar_select %p951_p10, 1, 0 }
  0x2d   : > { %s699_s19 = scalar_lea.hbm %s959_s10, 1024  ;;  %s704_s8 = scalar_lea.hbm %s1085_s0, 3072 }
  0x2e   : > { %p700_p0 = scmp.ne.s32.totalorder %s959_s10, %s699_s19  ;;  %p705_p3 = scmp.lt.s32.totalorder %s959_s10, %s1085_s0 }
  0x2f   : > { %p706_p4 = scmp.lt.s32.totalorder %s704_s8, %s699_s19 }
  0x30   : > { %p702_p1 = pnand %p700_p0, %p921_p12 }
  0x31   : > { %p707_p5 = por %p706_p4, %p705_p3 }
  0x32   : > { %p703_p2 = pneg %p702_p1 }
  0x34   : > { %p708_p6 = pnand %p707_p5, %p703_p2 }
  0x36   : > { %711 = shalt.err (!%p708_p6)
}
  0x37   : > { %s712_s22 = scalar_lea.vmem %s962_s12, 1024  ;;  %s826_s24 = smov [#allocation4]  }
  0x38   : > { %p713_p11 = scmp.ne.s32.totalorder %s962_s12, %s712_s22  ;;  %s717_s18 = sshll.u32 %s826_s24, 4  ;;  %s718_s18 = int_to_ptr.vmem [resolvable:$false] %s717_s18 }
  0x39   : > { %s719_s29 = scalar_lea.vmem %s718_s18, 2048  ;;  %p720_p7 = scmp.lt.s32.totalorder %s962_s12, %s718_s18 }
  0x3a   : > { %p715_p13 = pnand %p713_p11, %p921_p12  ;;  %p721_p0 = scmp.lt.s32.totalorder %s719_s29, %s712_s22 }
  0x3c   : > { %p716_p9 = pneg %p715_p13  ;;  %p722_p1 = por %p721_p0, %p720_p7 }
  0x3e   : > { %p723_p10 = pnand %p722_p1, %p716_p9 }
  0x40   : > { %726 = shalt.err (!%p723_p10)
}
  0x41   : > { %606 = dma.hbm_to_vmem [thread:$0]  (!%p899_p8), %s959_s10, 1024, %s962_s12, %s138_s4, %s824_s28, %s824_s28, %s825_s30  }
  0x42   : > { %s183_s19 = scalar_lea.vmem [#allocation9], %s894_s23  ;;  %s727_s27 = scalar_lea.hbm %s968_s15, 1024 }
  0x43   : > { %s190_s26 = sshll.u32 %s183_s19, 4  ;;  %p728_p2 = scmp.ne.s32.totalorder %s968_s15, %s727_s27  ;;  %s191_s26 = int_to_ptr.vmem [resolvable:$true] %s190_s26 }
  0x44   : > { %s732_s11 = scalar_lea.hbm %s1087_s2, 3072  ;;  %p733_p4 = scmp.lt.s32.totalorder %s968_s15, %s1087_s2 }
  0x45   : > { %p730_p10 = pnand %p728_p2, %p921_p12  ;;  %p734_p5 = scmp.lt.s32.totalorder %s732_s11, %s727_s27 }
  0x47   : > { %p731_p3 = pneg %p730_p10  ;;  %p735_p6 = por %p734_p5, %p733_p4 }
  0x49   : > { %p736_p11 = pnand %p735_p6, %p731_p3 }
  0x4b   : > { %739 = shalt.err (!%p736_p11)
}
  0x4c   : > { %s740_s23 = scalar_lea.vmem %s191_s26, 1024  ;;  %s827_s10 = smov [#allocation9]  }
  0x4d   : > { %p741_p13 = scmp.ne.s32.totalorder %s191_s26, %s740_s23  ;;  %s745_s12 = sshll.u32 %s827_s10, 4  ;;  %s746_s12 = int_to_ptr.vmem [resolvable:$false] %s745_s12 }
  0x4e   : > { %s747_s4 = scalar_lea.vmem %s746_s12, 2048  ;;  %p748_p0 = scmp.lt.s32.totalorder %s191_s26, %s746_s12 }
  0x4f   : > { %p743_p9 = pnand %p741_p13, %p921_p12  ;;  %p749_p1 = scmp.lt.s32.totalorder %s747_s4, %s740_s23 }
  0x51   : > { %p744_p7 = pneg %p743_p9  ;;  %p750_p2 = por %p749_p1, %p748_p0 }
  0x53   : > { %p751_p10 = pnand %p750_p2, %p744_p7 }
  0x55   : > { %754 = shalt.err (!%p751_p10)
}
  0x56   : > { %612 = dma.hbm_to_vmem [thread:$0]  (!%p899_p8), %s968_s15, 1024, %s191_s26, %s915_s5, %s824_s28, %s824_s28, %s825_s30  }
  0x57   : > { %p1096_p12 = scmp.ne.s32.totalorder %s1095_s6, 0 }
  0x58   : > { %s204_s7 = sand.u32 (!%p1096_p12), 1, %s813_s13   ;;  %p1097_p3 = scmp.ne.s32.totalorder (!%p1096_p12), %s1090_s21, 0 }
  0x59   : > { %202 = sbr.rel (%p1096_p12) target bundleno = 465 (0x1d1), region = 32  ;;  %s575_s18 = sshll.u32 (!%p1096_p12), %s204_s7, 6 }
  0x5a   : > { %s205_s29 = scalar_lea.sflag (!%p1096_p12), [#allocation5], %s204_s7  ;;  %s1019_s19 = scalar_lea.vmem (!%p1096_p12), [#allocation4], %s575_s18 }
  0x5e   : > { %796 = dma.done.wait (%p1097_p3), %s205_s29, 1024  }
  0x5f   : > { %798 = vsyncadd (%p1097_p3), %s205_s29, 4294966272  ;;  %s213_s25 = sand.u32 1, %s870_s16   ;;  %s1026_s5 = scalar_lea.vmem [#allocation7], %s575_s18 }
  0x60   : > { %s214_s27 = scalar_lea.sflag [#allocation8], %s213_s25 }
  0x61   : > { %800 = dma.done.wait (%p1097_p3), %s214_s27, 2048  }
  0x62   : > { %802 = vsyncadd (%p1097_p3), %s214_s27, 4294965248  ;;  %s1032_s28 = scalar_lea.vmem [#allocation9], %s575_s18  ;;  %p578_p8 = scmp.ne.s32.totalorder %s870_s16, 0 }
  0x64   : > { %260 = sbr.rel (%p578_p8) target bundleno = 114 (0x72), region = 48 }
  0x69   : > { %v828_v0 = vmov 0.0  }
  0x6a   : > { %261 = vst [vmem:[#allocation2 + $0x30] sm:$0xff] %v828_v0  ;;  %262 = vst [vmem:[#allocation2] sm:$0xff] %v828_v0 }
  0x6b   : > { %263 = vst [vmem:[#allocation2 + $0x18] sm:$0xff] %v828_v0  ;;  %264 = vst [vmem:[#allocation2 + $0x10] sm:$0xff] %v828_v0 }
  0x6c   : > { %265 = vst [vmem:[#allocation2 + $0x8] sm:$0xff] %v828_v0  ;;  %266 = vst [vmem:[#allocation2 + $0x20] sm:$0xff] %v828_v0 }
  0x6d   : > { %267 = vst [vmem:[#allocation2 + $0x28] sm:$0xff] %v828_v0  ;;  %268 = vst [vmem:[#allocation2 + $0x38] sm:$0xff] %v828_v0 }
  0x6e   : > { %269 = vst [vmem:[#allocation3] sm:$0xff] %v828_v0  ;;  %270 = vst [vmem:[#allocation3 + $0x18] sm:$0xff] %v828_v0 }
  0x6f   : > { %271 = vst [vmem:[#allocation3 + $0x10] sm:$0xff] %v828_v0  ;;  %272 = vst [vmem:[#allocation3 + $0x20] sm:$0xff] %v828_v0 }
  0x70   : > { %273 = vst [vmem:[#allocation3 + $0x28] sm:$0xff] %v828_v0  ;;  %274 = vst [vmem:[#allocation3 + $0x8] sm:$0xff] %v828_v0 }
  0x71   : > { %275 = vst [vmem:[#allocation3 + $0x30] sm:$0xff] %v828_v0  ;;  %276 = vst [vmem:[#allocation3 + $0x38] sm:$0xff] %v828_v0 }
  0x72 PF: > { %v285_v1 = vld [vmem:[%s1026_s5] sm:$0xff]  ;;  %v286_v2 = vld [vmem:[%s1026_s5 + $0x8] sm:$0xff]  ;;  %v287_v3 = vld [vmem:[%s1026_s5 + $0x10] sm:$0xff]  ;;  %p579_p4 = scmp.ne.s32.totalorder %s870_s16, 2 }
  0x73   : > { %653 = vrcp.f32 %v285_v1  ;;  %v288_v4 = vld [vmem:[%s1026_s5 + $0x18] sm:$0xff]  ;;  %v289_v5 = vld [vmem:[%s1026_s5 + $0x20] sm:$0xff]  ;;  %v290_v6 = vld [vmem:[%s1026_s5 + $0x28] sm:$0xff]  ;;  %s829_s9 = smov (!%p579_p4), 0.0  }
  0x74   : > { %655 = vrcp.f32 %v286_v2  ;;  %v291_v7 = vld [vmem:[%s1026_s5 + $0x30] sm:$0xff]  ;;  %v292_v8 = vld [vmem:[%s1026_s5 + $0x38] sm:$0xff]  ;;  %v277_v9 = vld [vmem:[%s1019_s19] sm:$0xff] }
  0x75   : > { %657 = vrcp.f32 %v287_v3  ;;  %v278_v10 = vld [vmem:[%s1019_s19 + $0x8] sm:$0xff]  ;;  %v279_v14 = vld [vmem:[%s1019_s19 + $0x10] sm:$0xff]  ;;  %v293_v15 = vld [vmem:[%s1032_s28] sm:$0xff] }
  0x76   : > { %659 = vrcp.f32 %v288_v4  ;;  %v280_v17 = vld [vmem:[%s1019_s19 + $0x18] sm:$0xff]  ;;  %v294_v20 = vld [vmem:[%s1032_s28 + $0x8] sm:$0xff]  ;;  %v281_v21 = vld [vmem:[%s1019_s19 + $0x20] sm:$0xff] }
  0x77   : > { %661 = vrcp.f32 %v289_v5  ;;  %v333_v23 = vld [vmem:[#allocation2 + $0x30] sm:$0xff]  ;;  %v334_v28 = vld [vmem:[#allocation2] sm:$0xff]  ;;  %v282_v31 = vld [vmem:[%s1019_s19 + $0x28] sm:$0xff] }
  0x78   : > { %663 = vrcp.f32 %v290_v6  ;;  %v295_v29 = vld [vmem:[%s1032_s28 + $0x10] sm:$0xff]  ;;  %v296_v34 = vld [vmem:[%s1032_s28 + $0x18] sm:$0xff]  ;;  %v357_v37 = vld [vmem:[#allocation3] sm:$0xff] }
  0x79   : > { %665 = vrcp.f32 %v291_v7  ;;  %v283_v36 = vld [vmem:[%s1019_s19 + $0x30] sm:$0xff]  ;;  %v335_v40 = vld [vmem:[#allocation2 + $0x18] sm:$0xff]  ;;  %v297_v42 = vld [vmem:[%s1032_s28 + $0x20] sm:$0xff] }
  0x7a   : > { %667 = vrcp.f32 %v292_v8  ;;  %v284_v43 = vld [vmem:[%s1019_s19 + $0x38] sm:$0xff]  ;;  %v336_v48 = vld [vmem:[#allocation2 + $0x10] sm:$0xff]  ;;  %v337_v54 = vld [vmem:[#allocation2 + $0x8] sm:$0xff] }
  0x7b   : > { %v358_v51 = vld [vmem:[#allocation3 + $0x18] sm:$0xff]  ;;  %v298_v55 = vld [vmem:[%s1032_s28 + $0x28] sm:$0xff]  ;;  %v299_v62 = vld [vmem:[%s1032_s28 + $0x30] sm:$0xff] }
  0x7c   : > { %v359_v0 = vld [vmem:[#allocation3 + $0x10] sm:$0xff]  ;;  %v338_v2 = vld [vmem:[#allocation2 + $0x20] sm:$0xff]  ;;  %v300_v4 = vld [vmem:[%s1032_s28 + $0x38] sm:$0xff] }
  0x7d   : > { %v360_v7 = vld [vmem:[#allocation3 + $0x20] sm:$0xff] }
  0x80   : > { %v654_v11 = vpop.eup %653 }
  0x81   : > { %v656_v12 = vpop.eup %655  ;;  %v302_v13 = vmul.f32 %v654_v11, %v277_v9 }
  0x82   : > { %v304_v16 = vmul.f32 %v656_v12, %v278_v10  ;;  %v658_v18 = vpop.eup %657  ;;  %v339_v10 = vld [vmem:[#allocation2 + $0x28] sm:$0xff] }
  0x83   : > { %v317_v19 = vmax.f32 %v302_v13, 1.0  ;;  %v660_v22 = vpop.eup %659  ;;  %v306_v25 = vmul.f32 %v658_v18, %v279_v14  ;;  %v361_v13 = vld [vmem:[#allocation3 + $0x28] sm:$0xff] }
  0x84   : > { %v318_v24 = vmax.f32 %v304_v16, 1.0  ;;  %v662_v26 = vpop.eup %661  ;;  %v308_v30 = vmul.f32 %v660_v22, %v280_v17  ;;  %v362_v18 = vld [vmem:[#allocation3 + $0x8] sm:$0xff] }
  0x85   : > { %v325_v27 = vmul.f32 %v317_v19, %v293_v15  ;;  %v319_v33 = vmax.f32 %v306_v25, 1.0  ;;  %v310_v35 = vmul.f32 %v662_v26, %v281_v21  ;;  %v664_v38 = vpop.eup %663  ;;  %v340_v15 = vld [vmem:[#allocation2 + $0x38] sm:$0xff] }
  0x86   : > { %v326_v32 = vmul.f32 %v318_v24, %v294_v20  ;;  %v320_v41 = vmax.f32 %v308_v30, 1.0  ;;  %v666_v45 = vpop.eup %665  ;;  %v312_v50 = vmul.f32 %v664_v38, %v282_v31 }
  0x87   : > { %v341_v39 = vadd.f32 %v333_v23, %v325_v27  ;;  %v365_v44 = vmul.f32 %v325_v27, %v325_v27  ;;  %v327_v47 = vmul.f32 %v319_v33, %v295_v29  ;;  %v321_v49 = vmax.f32 %v310_v35, 1.0  ;;  %v668_v52 = vpop.eup %667  ;;  %v363_v23 = vld [vmem:[#allocation3 + $0x30] sm:$0xff]  ;;  %v364_v27 = vld [vmem:[#allocation3 + $0x38] sm:$0xff] }
  0x88   : > { %v342_v46 = vadd.f32 %v334_v28, %v326_v32  ;;  %v328_v53 = vmul.f32 %v320_v41, %v296_v34  ;;  %v314_v56 = vmul.f32 %v666_v45, %v283_v36  ;;  %v366_v58 = vmul.f32 %v326_v32, %v326_v32 }
  0x89   : > { %349 = vst [vmem:[#allocation2 + $0x30] sm:$0xff] %v341_v39  ;;  %v373_v57 = vadd.f32 %v365_v44, %v357_v37  ;;  %v343_v59 = vadd.f32 %v335_v40, %v327_v47  ;;  %v329_v60 = vmul.f32 %v321_v49, %v297_v42  ;;  %v322_v61 = vmax.f32 %v312_v50, 1.0 }
  0x8a   : > { %350 = vst [vmem:[#allocation2] sm:$0xff] %v342_v46  ;;  %v316_v63 = vmul.f32 %v668_v52, %v284_v43  ;;  %v344_v1 = vadd.f32 %v336_v48, %v328_v53  ;;  %v323_v3 = vmax.f32 %v314_v56, 1.0  ;;  %v374_v5 = vadd.f32 %v366_v58, %v358_v51 }
  0x8b   : > { %381 = vst [vmem:[#allocation3] sm:$0xff] %v373_v57  ;;  %v367_v6 = vmul.f32 %v327_v47, %v327_v47  ;;  %351 = vst [vmem:[#allocation2 + $0x18] sm:$0xff] %v343_v59  ;;  %v345_v8 = vadd.f32 %v337_v54, %v329_v60  ;;  %v330_v9 = vmul.f32 %v322_v61, %v298_v55 }
  0x8c   : > { %v324_v11 = vmax.f32 %v316_v63, 1.0  ;;  %v368_v12 = vmul.f32 %v328_v53, %v328_v53  ;;  %352 = vst [vmem:[#allocation2 + $0x10] sm:$0xff] %v344_v1  ;;  %v331_v14 = vmul.f32 %v323_v3, %v299_v62  ;;  %382 = vst [vmem:[#allocation3 + $0x18] sm:$0xff] %v374_v5  ;;  %v369_v17 = vmul.f32 %v329_v60, %v329_v60 }
  0x8d   : > { %v375_v16 = vadd.f32 %v367_v6, %v359_v0  ;;  %353 = vst [vmem:[#allocation2 + $0x8] sm:$0xff] %v345_v8  ;;  %v346_v19 = vadd.f32 %v338_v2, %v330_v9  ;;  %v370_v22 = vmul.f32 %v330_v9, %v330_v9 }
  0x8e   : > { %v332_v20 = vmul.f32 %v324_v11, %v300_v4  ;;  %v376_v21 = vadd.f32 %v368_v12, %v360_v7  ;;  %v347_v24 = vadd.f32 %v339_v10, %v331_v14  ;;  %v377_v25 = vadd.f32 %v369_v17, %v361_v13 }
  0x8f   : > { %383 = vst [vmem:[#allocation3 + $0x10] sm:$0xff] %v375_v16  ;;  %v371_v26 = vmul.f32 %v331_v14, %v331_v14  ;;  %354 = vst [vmem:[#allocation2 + $0x20] sm:$0xff] %v346_v19  ;;  %v378_v29 = vadd.f32 %v370_v22, %v362_v18 }
  0x90   : > { %v348_v28 = vadd.f32 %v340_v15, %v332_v20  ;;  %384 = vst [vmem:[#allocation3 + $0x20] sm:$0xff] %v376_v21  ;;  %v372_v30 = vmul.f32 %v332_v20, %v332_v20  ;;  %355 = vst [vmem:[#allocation2 + $0x28] sm:$0xff] %v347_v24  ;;  %392 = sbr.rel (%p579_p4) target bundleno = 450 (0x1c2), region = 52 }
  0x91   : > { %385 = vst [vmem:[#allocation3 + $0x28] sm:$0xff] %v377_v25  ;;  %v379_v31 = vadd.f32 %v371_v26, %v363_v23  ;;  %386 = vst [vmem:[#allocation3 + $0x8] sm:$0xff] %v378_v29 }
  0x92   : > { %356 = vst [vmem:[#allocation2 + $0x38] sm:$0xff] %v348_v28  ;;  %v380_v32 = vadd.f32 %v372_v30, %v364_v27 }
  0x93   : > { %387 = vst [vmem:[#allocation3 + $0x30] sm:$0xff] %v379_v31 }
  0x94   : > { %388 = vst [vmem:[#allocation3 + $0x38] sm:$0xff] %v380_v32 }
  0x95   : > { %v393_v33 = vld [vmem:[#allocation2 + $0x30] sm:$0xff]  ;;  %v394_v34 = vld [vmem:[#allocation2] sm:$0xff]  ;;  %v395_v35 = vld [vmem:[#allocation2 + $0x18] sm:$0xff]  ;;  %vm460_vm2 = vcmask 0  }
  0x96   : > { %v401_v36 = vadd.f32 %v394_v34, %v393_v33  ;;  %v396_v37 = vld [vmem:[#allocation2 + $0x10] sm:$0xff]  ;;  %v417_v38 = vld [vmem:[#allocation3] sm:$0xff]  ;;  %v418_v40 = vld [vmem:[#allocation3 + $0x18] sm:$0xff] }
  0x97   : > { %v419_v41 = vld [vmem:[#allocation3 + $0x10] sm:$0xff]  ;;  %v397_v42 = vld [vmem:[#allocation2 + $0x8] sm:$0xff]  ;;  %v425_v43 = vadd.f32 %v418_v40, %v417_v38  ;;  %v420_v45 = vld [vmem:[#allocation3 + $0x20] sm:$0xff] }
  0x98   : > { %v402_v39 = vadd.f32 %v401_v36, %v395_v35  ;;  %v398_v46 = vld [vmem:[#allocation2 + $0x20] sm:$0xff]  ;;  %v421_v49 = vld [vmem:[#allocation3 + $0x28] sm:$0xff] }
  0x99   : > { %v426_v47 = vadd.f32 %v425_v43, %v419_v41  ;;  %v399_v50 = vld [vmem:[#allocation2 + $0x28] sm:$0xff]  ;;  %v400_v54 = vld [vmem:[#allocation2 + $0x38] sm:$0xff] }
  0x9a   : > { %v403_v44 = vadd.f32 %v402_v39, %v396_v37  ;;  %v422_v53 = vld [vmem:[#allocation3 + $0x8] sm:$0xff]  ;;  %v423_v57 = vld [vmem:[#allocation3 + $0x30] sm:$0xff] }
  0x9b   : > { %v427_v51 = vadd.f32 %v426_v47, %v420_v45  ;;  %v424_v60 = vld [vmem:[#allocation3 + $0x38] sm:$0xff] }
  0x9c   : > { %v404_v48 = vadd.f32 %v403_v44, %v397_v42 }
  0x9d   : > { %v428_v55 = vadd.f32 %v427_v51, %v421_v49 }
  0x9e   : > { %v405_v52 = vadd.f32 %v404_v48, %v398_v46 }
  0x9f   : > { %v429_v58 = vadd.f32 %v428_v55, %v422_v53 }
  0xa0   : > { %v406_v56 = vadd.f32 %v405_v52, %v399_v50 }
  0xa1   : > { %v430_v61 = vadd.f32 %v429_v58, %v423_v57 }
  0xa2   : > { %v407_v59 = vadd.f32 %v406_v56, %v400_v54 }
  0xa3   : > { %v431_v62 = vadd.f32 %v430_v61, %v424_v60 }
  0xa4   : > { %408 = vadd.xlane.f32.xlu0 %v407_v59 }
  0xa8   : > { %432 = vadd.xlane.f32.xlu0 %v431_v62 }
 0x12d   : > { %v409_v63 = vpop.xlane.xlu0 %408 }
 0x12e   : > { %v410_v0 = vrot.slane %v409_v63, 4 }
 0x130   : > { %v411_v1 = vadd.f32 %v410_v0, %v409_v63 }
 0x131   : > { %v433_v2 = vpop.xlane.xlu0 %432 }
 0x132   : > { %v412_v3 = vrot.slane %v411_v1, 2  ;;  %v434_v4 = vrot.slane %v433_v2, 4 }
 0x134   : > { %v435_v5 = vadd.f32 %v434_v4, %v433_v2  ;;  %v413_v6 = vadd.f32 %v412_v3, %v411_v1 }
 0x136   : > { %v436_v7 = vrot.slane %v435_v5, 2  ;;  %v414_v8 = vrot.slane %v413_v6, 1 }
 0x138   : > { %v437_v9 = vadd.f32 %v436_v7, %v435_v5  ;;  %v415_v10 = vadd.f32 %v414_v8, %v413_v6 }
 0x13a   : > { %587 = vpush %v415_v10  ;;  %v438_v11 = vrot.slane %v437_v9, 1 }
 0x13c   : > { %v439_v12 = vadd.f32 %v438_v11, %v437_v9 }
 0x13e   : > { %589 = vpush %v439_v12 }
 0x16b   : > { %s588_s21 = spop %587 }
 0x16c   : > { %s442_s30 = smul.f32 %s588_s21, %s588_s21 }
 0x16d   : > { %s441_s24 = smul.f32 5e-05, %s588_s21 }
 0x16e   : > { %s443_s6 = smul.f32 5e-05, %s442_s30 }
 0x16f   : > { %s590_s15 = spop %589 }
 0x170   : > { %s444_s26 = ssub.f32 %s590_s15, %s443_s6 }
 0x172   : > { %s445_s8 = smul.f32 5.00025e-05, %s444_s26 }
 0x174   : > { %s446_s11 = smax.f32 %s829_s9, %s445_s8 }
 0x175   : > { %s447_s22 = smul.f32 5e-05, %s446_s11 }
 0x177   : > { %v448_v13 = vstv %s447_s22 }
 0x178   : > { %669 = vrsqrt.f32 %v448_v13  ;;  %vm451_vm0 = vcmp.eq.f32.partialorder %v448_v13, inf  ;;  %v454_v16 = vand.u32 2147483648, %v448_v13  ;;  %vm453_vm1 = vcmp.eq.f32.partialorder %v448_v13, 0.0 }
 0x185   : > { %v670_v14 = vpop.eup %669 }
 0x186   : > { %v450_v15 = vmul.f32 %v670_v14, %v448_v13 }
 0x188   : > { %v452_v17 = vsel %vm451_vm0, %v448_v13, %v450_v15 }
 0x189   : > { %v455_v18 = vsel %vm453_vm1, %v454_v16, %v452_v17 }
 0x18a   : > { %591 = vpush %v455_v18 }
 0x1bb   : > { %s592_s23 = spop %591 }
 0x1bc   : > { %s457_s10 = smul.f32 0.5, %s592_s23 }
 0x1be   : > { %s458_s12 = sadd.f32 %s457_s10, %s441_s24 }
 0x1c0   : > { %v459_v19 = vstv %s458_s12 }
 0x1c1   : > { %461 = vst.msk [vmem:[#allocation10] sm:$0x1] %vm460_vm2, %v459_v19 }
 0x1c2 PF: > { %p614_p5 = scmp.eq.s32.totalorder %s870_s16, 2  ;;  %s830_s4 = smov [#allocation10]  }
 0x1c3   : > { %s469_s7 = sshll.u32 %s830_s4, 4  ;;  %s470_s7 = int_to_ptr.vmem [resolvable:$true] %s469_s7 }
 0x1c4   : > { %s755_s18 = scalar_lea.vmem %s470_s7, 16  ;;  %s761_s29 = scalar_lea.vmem %s470_s7, 32 }
 0x1c5   : > { %p756_p6 = scmp.ne.s32.totalorder %s470_s7, %s755_s18  ;;  %p762_p9 = scmp.lt.s32.totalorder %s470_s7, %s470_s7 }
 0x1c6   : > { %p763_p7 = scmp.lt.s32.totalorder %s761_s29, %s755_s18 }
 0x1c7   : > { %p757_p11 = pnand %p756_p6, %p614_p5 }
 0x1c8   : > { %p764_p0 = por %p763_p7, %p762_p9 }
 0x1c9   : > { %p758_p13 = pneg %p757_p11 }
 0x1cb   : > { %p765_p1 = pnand %p764_p0, %p758_p13 }
 0x1cd   : > { %768 = shalt.err (!%p765_p1)
}
 0x1ce   : > { %600 = dma.vmem_to_hbm [thread:$0]  (%p614_p5), %s470_s7, 16, %s1088_s3, [#allocation6]  }
 0x1cf   : > { %804 = dma.done.wait (%p614_p5), [#allocation6], 16  }
 0x1d0   : > { %806 = vsyncadd (%p614_p5), [#allocation6], 4294967280 }
 0x1d1 PF: > { %p17_p2 = scmp.ge.s32.totalorder %s873_s17, 5   ;;  %s1098_s12 = smov %s813_s13 }
 0x1d2   : > { %s1099_s13 = smov %s817_s14  ;;  %s1100_s14 = smov %s883_s20 }
 0x1d3   : > { %s1101_s15 = smov %s873_s17  ;;  %19 = sbr.rel (!%p17_p2) target bundleno = 6 (0x6), region = 101 }
 0x1d8   :  { %482 = vsyncpa [#allocation5], 1 }
 0x1d9   :  { %484 = vsyncpa [#allocation5 + $0x1], 1 }
 0x1da   :  { %485 = vsyncpa [#allocation8], 1 }
 0x1db   :  { %487 = vsyncpa [#allocation8 + $0x1], 1 }
 0x1dc   :  { %488 = vsyncpa [#allocation6], 1 }
 0x1dd   :  { %490 = vsyncpa [#allocation6 + $0x1], 1 }

</bundles_post_ra>
